<compile_context>
chip_gen: v7x
topology: tpu7x:2x2x1
jax: 0.10.0
libtpu: 0.0.40
codegen_flags: <defaults>
</compile_context>

<pallas_src>
import jax
import jax.numpy as jnp
from jax import lax
from jax.experimental import pallas as pl
from jax.experimental.pallas import tpu as pltpu


def _round_up(v, m):
    return ((v + m - 1) // m) * m


def _sublane_pad(dtype):
    # VMEM second-to-last-dim padding: 8 for 32-bit, 16 for 16-bit, 32 for 8-bit.
    return 32 // jnp.dtype(dtype).itemsize


def make_focal_loss_fn(N, C, HW, alpha_vec, gamma, x_dtype,
                       lane_tile=None, n_chunks=None,
                       vmem_budget_bytes=40 << 20,
                       vmem_limit_bytes=48 << 20):
    """Returns fn(x3d:(N,C,HW), t3d:(N,1,HW)[, alpha:(C,1)]) -> (N, K, 1, TL)."""
    hw_pad = _round_up(HW, 128)
    x_item = jnp.dtype(x_dtype).itemsize

    # Total live VMEM per lane column (bytes):
    #   2x x block (C padded to the dtype's sublane tile)        [double buffer]
    # + 2x int32 target row (1 sublane padded to 8)              [double buffer]
    # + 2x f32 output row (1 sublane padded to 8)                [conservative]
    c_pad_x = _round_up(max(C, 1), _sublane_pad(x_dtype))
    per_lane = 2 * c_pad_x * x_item + 2 * 8 * 4 + 2 * 8 * 4

    if lane_tile is None:
        tl = (vmem_budget_bytes // per_lane) // 128 * 128
        tl = max(128, min(tl, hw_pad))
        if N == 1 and hw_pad > 128:
            # Keep >=2 spatial tiles so the chunked "parallel" axis can feed
            # both v7x TensorCores even for batch-1 segmentation inputs.
            tl = min(tl, _round_up(pl.cdiv(HW, 2), 128))
    else:
        tl = lane_tile
    assert tl % 128 == 0
    n_cols = pl.cdiv(HW, tl)

    if n_chunks is None:
        n_chunks = 2 if N == 1 else 1          # v7x: split spatially when N==1
    n_chunks = max(1, min(n_chunks, n_cols))
    ncpc = pl.cdiv(n_cols, n_chunks)           # column tiles per chunk
    last_blk = n_cols - 1

    gamma = float(gamma)
    gamma_int = int(gamma) if gamma.is_integer() else None
    use_alpha = alpha_vec is not None
    if use_alpha:
        assert len(alpha_vec) == C, "alpha must have one entry per class"

    def kernel(x_ref, t_ref, *rest):
        o_ref = rest[-1]
        a_ref = rest[0] if use_alpha else None

        ck = pl.program_id(1)
        j = pl.program_id(2)
        jj = ck * ncpc + j                     # global spatial tile (may overrun)

        @pl.when(j == 0)
        def _init():
            o_ref[...] = jnp.zeros_like(o_ref)

        x = x_ref[...].astype(jnp.float32)     # (C, TL) logits
        t = t_ref[...]                         # (1, TL) int32 labels

        # Lane mask for ragged spatial tails and fully-overrun chunk tiles.
        col = jj * tl + lax.broadcasted_iota(jnp.int32, (1, tl), 1)
        valid = col < HW                       # (1, TL)

        # log_softmax over the class (sublane) axis.
        m = jnp.max(x, axis=0, keepdims=True)  # (1, TL)
        z = x - m                              # (C, TL)
        ez = jnp.exp(z)                        # (C, TL)  (reused for pt)
        s = jnp.sum(ez, axis=0, keepdims=True)
        lse = jnp.log(s)                       # (1, TL)

        # Shared one-hot over classes: gather z[target], exp(z)[target], alpha.
        cls = lax.broadcasted_iota(jnp.int32, (C, tl), 0)
        hit = cls == t                         # (C, TL)
        z_sel = jnp.sum(jnp.where(hit, z, 0.0), axis=0, keepdims=True)
        ez_sel = jnp.sum(jnp.where(hit, ez, 0.0), axis=0, keepdims=True)
        logpt = z_sel - lse                    # (1, TL)

        # pt = exp(z_t) / sum(exp(z)): reuse exp(z) (no second exp), approx EUP
        # reciprocal + two Newton steps -> full f32 accuracy, near-free.
        inv_s = pl.reciprocal(s, approx=True)
        inv_s = inv_s * (2.0 - s * inv_s)
        inv_s = inv_s * (2.0 - s * inv_s)
        pt = ez_sel * inv_s                    # (1, TL)

        if use_alpha:
            # alpha gather via the same one-hot mask (XLU sublane reduce);
            # a_ref is a tiny (C, 1) input fetched once, lane-broadcast here.
            a_col = a_ref[...].astype(jnp.float32)          # (C, 1)
            at = jnp.sum(jnp.where(hit, a_col, 0.0), axis=0, keepdims=True)
            logpt = logpt * at

        # Clamp: fp rounding can push pt marginally above 1, which would NaN
        # the non-integer-gamma pow path.
        one_minus_pt = jnp.maximum(1.0 - pt, 0.0)
        if gamma_int is not None:
            focal = lax.integer_pow(one_minus_pt, gamma_int)   # VPU multiplies
        else:
            focal = one_minus_pt ** gamma                      # transcendental
        loss = jnp.where(valid, -focal * logpt, 0.0)

        # Lane-dense elementwise accumulation; the final scalar reduce happens
        # once in the wrapper on the tiny (N, K, 1, TL) partial array.
        o_ref[...] += loss

    def spatial_blk(ck, j):
        # Clamp so overrun tiles of the last chunk never DMA out of range;
        # their lanes are fully masked in-kernel anyway.
        return jnp.minimum(ck * ncpc + j, last_blk)

    in_specs = [
        # logits: full class axis on sublanes, spatial tile on lanes
        pl.BlockSpec((None, C, tl), lambda n, ck, j: (n, 0, spatial_blk(ck, j))),
        # targets: lane-dense int32 row matching the logits tile
        pl.BlockSpec((None, 1, tl), lambda n, ck, j: (n, 0, spatial_blk(ck, j))),
    ]
    if use_alpha:
        # tiny per-class alpha column; constant block index -> fetched once
        in_specs.append(pl.BlockSpec((C, 1), lambda n, ck, j: (0, 0)))

    out_specs = pl.BlockSpec((None, None, 1, tl), lambda n, ck, j: (n, ck, 0, 0))

    M = N * HW
    trans = M * (C + 2) + (0 if gamma_int is not None else 2 * M)
    cost = pl.CostEstimate(
        flops=int(8 * M * C + 16 * M),
        transcendentals=int(trans),
        bytes_accessed=int(M * C * x_item + 4 * M + 4 * N * n_chunks * tl),
    )

    return pl.pallas_call(
        kernel,
        out_shape=jax.ShapeDtypeStruct((N, n_chunks, 1, tl), jnp.float32),
        grid_spec=pltpu.PrefetchScalarGridSpec(
            num_scalar_prefetch=0,
            grid=(N, n_chunks, ncpc),
            in_specs=in_specs,
            out_specs=out_specs,
        ),
        compiler_params=pltpu.CompilerParams(
            dimension_semantics=("parallel", "parallel", "arbitrary"),
            vmem_limit_bytes=vmem_limit_bytes,
        ),
        cost_estimate=cost,
    )


def _normalize_alpha(alpha):
    # Mirrors the PyTorch __init__ handling of alpha.
    if alpha is None:
        return None
    if isinstance(alpha, (float, int)):
        return [float(alpha), 1.0 - float(alpha)]
    return [float(a) for a in alpha]


def focal_loss(x_nchw, target_nhw, alpha=None, gamma=2.0, size_average=True,
               lane_tile=None, n_chunks=None):
    """Glue: native (N, C, H*W) view (no transpose), Pallas tiled reduction."""
    N, C, H, W = x_nchw.shape
    HW = H * W
    # Keep logits in their native dtype (do NOT pre-upcast bf16); the kernel
    # upcasts per tile, so bf16 inputs halve the dominant HBM stream.
    x3 = x_nchw.reshape(N, C, HW)                      # contiguous -> free reshape
    t3 = target_nhw.reshape(N, 1, HW).astype(jnp.int32)
    alpha_vec = _normalize_alpha(alpha)

    fn = make_focal_loss_fn(N, C, HW, alpha_vec, gamma, x_nchw.dtype,
                            lane_tile=lane_tile, n_chunks=n_chunks)
    if alpha_vec is not None:
        a = jnp.asarray(alpha_vec, dtype=jnp.float32).reshape(C, 1)
        partials = fn(x3, t3, a)                       # (N, K, 1, TL) float32
    else:
        partials = fn(x3, t3)
    total = jnp.sum(partials)
    if size_average:
        return total / float(N * HW)
    return total


def focal_loss_ref(x_nchw, target_nhw, alpha=None, gamma=2.0, size_average=True):
    """Pure-JAX reference mirroring the PyTorch forward."""
    N, C, H, W = x_nchw.shape
    x2d = jnp.transpose(x_nchw.reshape(N, C, H * W), (0, 2, 1)).reshape(-1, C)
    t = target_nhw.reshape(-1).astype(jnp.int32)
    logp = jax.nn.log_softmax(x2d.astype(jnp.float32), axis=1)
    logpt = jnp.take_along_axis(logp, t[:, None], axis=1)[:, 0]
    pt = jnp.exp(logpt)
    alpha_vec = _normalize_alpha(alpha)
    if alpha_vec is not None:
        at = jnp.asarray(alpha_vec, dtype=jnp.float32)[t]
        logpt = logpt * at
    loss = -1.0 * (1.0 - pt) ** gamma * logpt
    return loss.mean() if size_average else loss.sum()


def _check(name, got, want, rtol=2e-5, atol=1e-6):
    got = jax.block_until_ready(got)
    assert jnp.allclose(got, want, rtol=rtol, atol=atol), (name, got, want)


if __name__ == "__main__":
    key = jax.random.PRNGKey(0)
    k1, k2, k3, k4, k5, k6 = jax.random.split(key, 6)

    # 1) Baseline: N=2, C=4, per-class alpha, gamma=2 (integer fast path).
    N, C, H, W = 2, 4, 16, 16
    gamma = 2.0
    alpha = [0.25, 0.75, 0.5, 0.5]
    x = jax.random.normal(k1, (N, C, H, W), dtype=jnp.float32)
    target = jax.random.randint(k2, (N, H, W), 0, C, dtype=jnp.int32)
    _check("f32_alpha_mean",
           focal_loss(x, target, alpha, gamma=gamma, size_average=True),
           focal_loss_ref(x, target, alpha, gamma=gamma, size_average=True))

    # 2) No alpha, sum reduction.
    _check("f32_noalpha_sum",
           focal_loss(x, target, None, gamma=gamma, size_average=False),
           focal_loss_ref(x, target, None, gamma=gamma, size_average=False))

    # 3) bf16 logits stay bf16 end-to-end (kernel upcasts per tile).
    x_bf16 = x.astype(jnp.bfloat16)
    _check("bf16_alpha_mean",
           focal_loss(x_bf16, target, alpha, gamma=gamma, size_average=True),
           focal_loss_ref(x_bf16, target, alpha, gamma=gamma, size_average=True))

    # 4) Scalar alpha with C=2 (mirrors torch's [alpha, 1-alpha] expansion).
    x2 = jax.random.normal(k3, (2, 2, 8, 16), dtype=jnp.float32)
    t2 = jax.random.randint(k4, (2, 8, 16), 0, 2, dtype=jnp.int32)
    _check("f32_scalar_alpha",
           focal_loss(x2, t2, 0.25, gamma=gamma, size_average=True),
           focal_loss_ref(x2, t2, 0.25, gamma=gamma, size_average=True))

    # 5) Batch-1 chunked spatial split (v7x dual-TC path): ragged tail + the
    #    clamped overrun tile of the last chunk (n_cols=3, n_chunks=2).
    x1 = jax.random.normal(k5, (1, 4, 16, 20), dtype=jnp.float32)
    t1 = jax.random.randint(k6, (1, 16, 20), 0, 4, dtype=jnp.int32)
    _check("f32_n1_chunked",
           focal_loss(x1, t1, alpha, gamma=gamma, size_average=True,
                      lane_tile=128),
           focal_loss_ref(x1, t1, alpha, gamma=gamma, size_average=True))

    print("KERNEL_OK")
</pallas_src>

<mosaic_0001>
module attributes {stable_mosaic.version = 11 : i64} {
  func.func @kernel(%arg0: i32, %arg1: i32, %arg2: i32, %arg3: memref<1x4x256xf32, #tpu.memory_space<vmem>>, %arg4: memref<1x1x256xi32, #tpu.memory_space<vmem>>, %arg5: memref<4x1xf32, #tpu.memory_space<vmem>>, %arg6: memref<1x1x1x256xf32, #tpu.memory_space<vmem>>) attributes {dimension_semantics = [#tpu.dimension_semantics<parallel>, #tpu.dimension_semantics<parallel>, #tpu.dimension_semantics<arbitrary>], iteration_bounds = array<i64: 2, 1, 1>, scalar_prefetch = 0 : i64, scratch_operands = 0 : i64, tpu.core_type = #tpu.core_type<tc>, window_params = [{transform_indices = @transform_0, window_bounds = array<i64: 1, 4, 256>}, {transform_indices = @transform_1, window_bounds = array<i64: 1, 1, 256>}, {pipeline_mode = #tpu.pipeline_mode<synchronous>, transform_indices = @transform_2, window_bounds = array<i64: 4, 1>}, {transform_indices = @transform_3, window_bounds = array<i64: 1, 1, 1, 256>}]} {
    %c1_i32 = arith.constant 1 : i32
    %0 = arith.muli %arg1, %c1_i32 : i32
    %1 = arith.addi %0, %arg2 : i32
    %c0_i32 = arith.constant 0 : i32
    %2 = arith.cmpi eq, %arg2, %c0_i32 : i32
    %3 = arith.extui %2 : i1 to i32
    %c0_i32_0 = arith.constant 0 : i32
    %4 = arith.cmpi ne, %3, %c0_i32_0 : i32
    scf.if %4 {
      %cst_30 = arith.constant 0.000000e+00 : f32
      %69 = vector.broadcast %cst_30 : f32 to vector<1x256xf32>
      %c0_31 = arith.constant 0 : index
      %c0_32 = arith.constant 0 : index
      %c0_33 = arith.constant 0 : index
      %c0_34 = arith.constant 0 : index
      %70 = vector.load %arg6[%c0_31, %c0_32, %c0_33, %c0_34] : memref<1x1x1x256xf32, #tpu.memory_space<vmem>>, vector<1x1x1x256xf32>
      %71 = vector.shape_cast %70 : vector<1x1x1x256xf32> to vector<1x256xf32>
      %72 = vector.shape_cast %69 : vector<1x256xf32> to vector<1x1x1x256xf32>
      tpu.vector_store %arg6[%c0_31, %c0_32, %c0_33, %c0_34], %72 {strides = array<i32>} : memref<1x1x1x256xf32, #tpu.memory_space<vmem>>, vector<1x1x1x256xf32>,
    } else {
    }
    %c0 = arith.constant 0 : index
    %c0_1 = arith.constant 0 : index
    %c0_2 = arith.constant 0 : index
    %5 = vector.load %arg3[%c0, %c0_1, %c0_2] : memref<1x4x256xf32, #tpu.memory_space<vmem>>, vector<1x4x256xf32>
    %6 = vector.shape_cast %5 : vector<1x4x256xf32> to vector<4x256xf32>
    %c0_3 = arith.constant 0 : index
    %c0_4 = arith.constant 0 : index
    %c0_5 = arith.constant 0 : index
    %7 = vector.load %arg4[%c0_3, %c0_4, %c0_5] : memref<1x1x256xi32, #tpu.memory_space<vmem>>, vector<1x1x256xi32>
    %8 = vector.shape_cast %7 : vector<1x1x256xi32> to vector<1x256xi32>
    %c256_i32 = arith.constant 256 : i32
    %9 = arith.muli %1, %c256_i32 : i32
    %10 = tpu.iota {dimensions = array<i32: 1>} : vector<1x256xi32>
    %11 = vector.broadcast %9 : i32 to vector<1x256xi32>
    %12 = arith.addi %11, %10 : vector<1x256xi32>
    %c256_i32_6 = arith.constant 256 : i32
    %13 = vector.broadcast %c256_i32_6 : i32 to vector<1x256xi32>
    %14 = arith.cmpi slt, %12, %13 : vector<1x256xi32>
    %cst = arith.constant dense<0xFF800000> : vector<256xf32>
    %15 = vector.multi_reduction <maximumf>, %6, %cst [0] : vector<4x256xf32> to vector<256xf32>
    %16 = vector.shape_cast %15 : vector<256xf32> to vector<1x256xf32>
    %17 = vector.broadcast %16 : vector<1x256xf32> to vector<4x256xf32>
    %18 = arith.subf %6, %17 : vector<4x256xf32>
    %19 = math.exp %18 : vector<4x256xf32>
    %cst_7 = arith.constant dense<0.000000e+00> : vector<256xf32>
    %20 = vector.multi_reduction <add>, %19, %cst_7 [0] : vector<4x256xf32> to vector<256xf32>
    %21 = vector.shape_cast %20 : vector<256xf32> to vector<1x256xf32>
    %22 = math.log %21 : vector<1x256xf32>
    %23 = tpu.iota {dimensions = array<i32: 0>} : vector<4x256xi32>
    %24 = vector.broadcast %8 : vector<1x256xi32> to vector<4x256xi32>
    %25 = arith.cmpi eq, %23, %24 : vector<4x256xi32>
    %cst_8 = arith.constant 0.000000e+00 : f32
    %26 = vector.broadcast %cst_8 : f32 to vector<4x256xf32>
    %27 = arith.select %25, %18, %26 : vector<4x256xi1>, vector<4x256xf32>
    %cst_9 = arith.constant dense<0.000000e+00> : vector<256xf32>
    %28 = vector.multi_reduction <add>, %27, %cst_9 [0] : vector<4x256xf32> to vector<256xf32>
    %29 = vector.shape_cast %28 : vector<256xf32> to vector<1x256xf32>
    %cst_10 = arith.constant 0.000000e+00 : f32
    %30 = vector.broadcast %cst_10 : f32 to vector<4x256xf32>
    %31 = arith.select %25, %19, %30 : vector<4x256xi1>, vector<4x256xf32>
    %cst_11 = arith.constant dense<0.000000e+00> : vector<256xf32>
    %32 = vector.multi_reduction <add>, %31, %cst_11 [0] : vector<4x256xf32> to vector<256xf32>
    %33 = vector.shape_cast %32 : vector<256xf32> to vector<1x256xf32>
    %34 = arith.subf %29, %22 : vector<1x256xf32>
    %35 = tpu.reciprocal %21 {approx = true} : vector<1x256xf32> -> vector<1x256xf32>
    %36 = arith.mulf %21, %35 : vector<1x256xf32>
    %cst_12 = arith.constant 2.000000e+00 : f32
    %37 = vector.broadcast %cst_12 : f32 to vector<1x256xf32>
    %38 = arith.subf %37, %36 : vector<1x256xf32>
    %39 = arith.mulf %35, %38 : vector<1x256xf32>
    %40 = arith.mulf %21, %39 : vector<1x256xf32>
    %cst_13 = arith.constant 2.000000e+00 : f32
    %41 = vector.broadcast %cst_13 : f32 to vector<1x256xf32>
    %42 = arith.subf %41, %40 : vector<1x256xf32>
    %43 = arith.mulf %39, %42 : vector<1x256xf32>
    %44 = arith.mulf %33, %43 : vector<1x256xf32>
    %c0_14 = arith.constant 0 : index
    %c0_15 = arith.constant 0 : index
    %45 = vector.load %arg5[%c0_14, %c0_15] : memref<4x1xf32, #tpu.memory_space<vmem>>, vector<4x1xf32>
    %cst_16 = arith.constant 0.000000e+00 : f32
    %46 = vector.shape_cast %45 : vector<4x1xf32> to vector<4x1xf32>
    %47 = vector.broadcast %46 : vector<4x1xf32> to vector<4x256xf32>
    %48 = vector.broadcast %cst_16 : f32 to vector<4x256xf32>
    %49 = arith.select %25, %47, %48 : vector<4x256xi1>, vector<4x256xf32>
    %cst_17 = arith.constant dense<0.000000e+00> : vector<256xf32>
    %50 = vector.multi_reduction <add>, %49, %cst_17 [0] : vector<4x256xf32> to vector<256xf32>
    %51 = vector.shape_cast %50 : vector<256xf32> to vector<1x256xf32>
    %52 = arith.mulf %34, %51 : vector<1x256xf32>
    %cst_18 = arith.constant 1.000000e+00 : f32
    %53 = vector.broadcast %cst_18 : f32 to vector<1x256xf32>
    %54 = arith.subf %53, %44 : vector<1x256xf32>
    %cst_19 = arith.constant 0.000000e+00 : f32
    %55 = vector.broadcast %cst_19 : f32 to vector<1x256xf32>
    %56 = arith.maximumf %54, %55 : vector<1x256xf32>
    %57 = arith.mulf %56, %56 : vector<1x256xf32>
    %cst_20 = arith.constant 0.000000e+00 : f32
    %58 = vector.broadcast %cst_20 : f32 to vector<1x256xf32>
    %59 = arith.subf %58, %57 : vector<1x256xf32>
    %60 = arith.mulf %59, %52 : vector<1x256xf32>
    %cst_21 = arith.constant 0.000000e+00 : f32
    %61 = vector.broadcast %cst_21 : f32 to vector<1x256xf32>
    %62 = arith.select %14, %60, %61 : vector<1x256xi1>, vector<1x256xf32>
    %c0_22 = arith.constant 0 : index
    %c0_23 = arith.constant 0 : index
    %c0_24 = arith.constant 0 : index
    %c0_25 = arith.constant 0 : index
    %63 = vector.load %arg6[%c0_22, %c0_23, %c0_24, %c0_25] : memref<1x1x1x256xf32, #tpu.memory_space<vmem>>, vector<1x1x1x256xf32>
    %64 = vector.shape_cast %63 : vector<1x1x1x256xf32> to vector<1x256xf32>
    %65 = arith.addf %64, %62 : vector<1x256xf32>
    %c0_26 = arith.constant 0 : index
    %c0_27 = arith.constant 0 : index
    %c0_28 = arith.constant 0 : index
    %c0_29 = arith.constant 0 : index
    %66 = vector.load %arg6[%c0_26, %c0_27, %c0_28, %c0_29] : memref<1x1x1x256xf32, #tpu.memory_space<vmem>>, vector<1x1x1x256xf32>
    %67 = vector.shape_cast %66 : vector<1x1x1x256xf32> to vector<1x256xf32>
    %68 = vector.shape_cast %65 : vector<1x256xf32> to vector<1x1x1x256xf32>
    tpu.vector_store %arg6[%c0_26, %c0_27, %c0_28, %c0_29], %68 {strides = array<i32>} : memref<1x1x1x256xf32, #tpu.memory_space<vmem>>, vector<1x1x1x256xf32>,
    return
  }
  func.func @transform_0(%arg0: i32, %arg1: i32, %arg2: i32) -> (i32, i32, i32) {
    %c1_i32 = arith.constant 1 : i32
    %0 = arith.muli %arg1, %c1_i32 : i32
    %1 = arith.addi %0, %arg2 : i32
    %c0_i32 = arith.constant 0 : i32
    %2 = arith.minsi %1, %c0_i32 : i32
    %c0_i32_0 = arith.constant 0 : i32
    %c0_i32_1 = arith.constant 0 : i32
    return %arg0, %c0_i32_0, %2 : i32, i32, i32
  }
  func.func @transform_1(%arg0: i32, %arg1: i32, %arg2: i32) -> (i32, i32, i32) {
    %c1_i32 = arith.constant 1 : i32
    %0 = arith.muli %arg1, %c1_i32 : i32
    %1 = arith.addi %0, %arg2 : i32
    %c0_i32 = arith.constant 0 : i32
    %2 = arith.minsi %1, %c0_i32 : i32
    %c0_i32_0 = arith.constant 0 : i32
    %c0_i32_1 = arith.constant 0 : i32
    return %arg0, %c0_i32_0, %2 : i32, i32, i32
  }
  func.func @transform_2(%arg0: i32, %arg1: i32, %arg2: i32) -> (i32, i32) {
    %c0_i32 = arith.constant 0 : i32
    %c0_i32_0 = arith.constant 0 : i32
    %c0_i32_1 = arith.constant 0 : i32
    return %c0_i32, %c0_i32_0 : i32, i32
  }
  func.func @transform_3(%arg0: i32, %arg1: i32, %arg2: i32) -> (i32, i32, i32, i32) {
    %c0_i32 = arith.constant 0 : i32
    %c0_i32_0 = arith.constant 0 : i32
    %c0_i32_1 = arith.constant 0 : i32
    return %arg0, %arg1, %c0_i32, %c0_i32_0 : i32, i32, i32, i32
  }
}

</mosaic_0001>

<bundles_post_ra>
// kernel: tpu_custom_call.1
= control target key start
LH: loop header
LB: loop body
LE: loop exit
PB: predicated region body
PF: predicated region fallthrough
CT: control target
= control target key end

     0   :  { %8 = vsyncpa [#allocation3], 0  ;;  %s1049_s0 = inlined_call_operand.hbm [shape: f32[2,4,256], index: 0, kind: input, shape index: {}]   ;;  %s1050_s1 = inlined_call_operand.vmem [shape: s32[2,1,256], index: 1, kind: input, shape index: {}]   ;;  %s1051_s2 = inlined_call_operand.vmem [shape: f32[4,1], index: 2, kind: input, shape index: {}]   ;;  %s1052_s3 = inlined_call_operand.hbm [shape: f32[2,1,1,256], index: 3, kind: output, shape index: {}]  }
   0x1   :  { %10 = vsyncpa [#allocation3 + $0x1], 0 }
   0x2   :  { %11 = vsyncpa [#allocation4], 0 }
   0x3   :  { %13 = vsyncpa [#allocation4 + $0x1], 0  ;;  %s825_s12 = smov 0   ;;  %s827_s13 = smov 0  }
   0x4   :  { %s829_s14 = smov 0   ;;  %s831_s15 = smov 0  }
   0x5   :  { %s833_s16 = smov 0   ;;  %s835_s17 = smov 0  }
   0x6 LB: > { %s591_s18 = sadd.s32 4294967295, %s798_s17   ;;  %s592_s19 = sadd.s32 4294967294, %s798_s17   ;;  %s798_s17 = sphi %s835_s17, %s19_s17   ;;  %s794_s16 = sphi %s833_s16, %s1070_s16   ;;  %s790_s15 = sphi %s831_s15, %s1069_s15   ;;  %s786_s14 = sphi %s829_s14, %s1068_s14   ;;  %s782_s13 = sphi %s827_s13, %s1067_s13   ;;  %s778_s12 = sphi %s825_s12, %s1066_s12  }
   0x7   : > { %s38_s20 = sadd.s32 1, %s794_s16  ;;  %s53_s21 = sadd.s32 1, %s786_s14 }
   0x8   : > { %p40_p0 = scmp.ge.s32.totalorder %s38_s20, 2  ;;  %p60_p1 = scmp.ne.s32.totalorder %s786_s14, %s782_s13 }
   0x9   : > { %p61_p2 = scmp.eq.s32.totalorder %s798_s17, 0  ;;  %p66_p3 = scmp.ne.s32.totalorder %s782_s13, %s778_s12 }
   0xa   : > { %s1072_s20 = smov (%p40_p0, %s38_s20), 0  ;;  %p67_p5 = scmp.eq.s32.totalorder %s591_s18, 0 }
   0xb   : > { %p866_p4 = por %p61_p2, %p60_p1  ;;  %s48_s23 = ssub.s32 %s794_s16, %s1072_s20 }
   0xc   : > { %p147_p6 = scmp.eq.s32.totalorder %s591_s18, 1  ;;  %p51_p7 = scmp.eq.s32.totalorder %s48_s23, 0 }
   0xd   : > { %p872_p8 = por %p67_p5, %p66_p3  ;;  %p153_p10 = scmp.eq.s32.totalorder %s592_s19, 1 }
   0xe   : > { %p876_p9 = por %p147_p6, %p60_p1  ;;  %p621_p13 = scmp.lt.s32.totalorder %s798_s17, 2 }
   0xf   : > { %s881_s26 = scalar_select %p51_p7, %s786_s14, %s53_s21  }
  0x10   : > { %s1056_s25 = scalar_select %p876_p9, 1, 0 }
  0x11   : > { %p883_p11 = por %p153_p10, %p66_p3  ;;  %s176_s28 = sand.u32 1, %s786_s14  }
  0x12   : > { %s595_s29 = sshll.u32 %s176_s28, 3  ;;  %s607_s30 = sshll.u32 %s794_s16, 7 }
  0x13   : > { %s1057_s27 = scalar_select %p883_p11, 1, 0 }
  0x14   : > { %s894_s6 = scalar_lea.hbm %s1049_s0, %s607_s30  ;;  %s180_s7 = scalar_lea.vmem [#allocation2], %s595_s29 }
  0x15   : > { %s193_s8 = sshll.u32 %s180_s7, 4  ;;  %p900_p0 = pnand %p621_p13, %p866_p4  ;;  %s896_s8 = int_to_ptr.vmem [resolvable:$true] %s193_s8 }
  0x16   : > { %s177_s10 = scalar_lea.sflag [#allocation3], %s176_s28  ;;  %s686_s11 = scalar_lea.hbm %s894_s6, 128 }
  0x17   : > { %p687_p3 = scmp.ne.s32.totalorder %s894_s6, %s686_s11  ;;  %p688_p5 = pneg %p900_p0 }
  0x18   : > { %s691_s21 = scalar_lea.hbm %s1049_s0, 256  ;;  %p692_p4 = scmp.lt.u32.totalorder %s894_s6, %s1049_s0 }
  0x19   : > { %p689_p6 = pnand %p688_p5, %p687_p3  ;;  %p693_p10 = scmp.lt.u32.totalorder %s691_s21, %s686_s11 }
  0x1a   : > { %p695_p12 = scmp.lt.u32.totalorder %s686_s11, %s894_s6 }
  0x1b   : > { %p690_p7 = pneg %p689_p6  ;;  %p694_p13 = por %p693_p10, %p692_p4 }
  0x1d   : > { %p696_p1 = por %p695_p12, %p694_p13 }
  0x1f   : > { %p697_p2 = pnand %p696_p1, %p690_p7 }
  0x21   : > { %700 = shalt.err (!%p697_p2)
}
  0x22   : > { %s701_s28 = scalar_lea.vmem %s896_s8, 128  ;;  %s800_s29 = smov [#allocation2]  }
  0x23   : > { %p702_p3 = scmp.ne.s32.totalorder %s896_s8, %s701_s28  ;;  %s706_s30 = sshll.u32 %s800_s29, 4  ;;  %s707_s30 = int_to_ptr.vmem [resolvable:$false] %s706_s30 }
  0x24   : > { %s708_s4 = scalar_lea.vmem %s707_s30, 256  ;;  %p709_p9 = scmp.lt.s32.totalorder %s896_s8, %s707_s30 }
  0x25   : > { %p704_p6 = pnand %p702_p3, %p688_p5  ;;  %p710_p4 = scmp.lt.s32.totalorder %s708_s4, %s701_s28 }
  0x27   : > { %p705_p11 = pneg %p704_p6  ;;  %p711_p10 = por %p710_p4, %p709_p9 }
  0x29   : > { %p712_p12 = pnand %p711_p10, %p705_p11 }
  0x2b   : > { %715 = shalt.err (!%p712_p12)
}
  0x2c   : > { %616 = dma.hbm_to_vmem [thread:$0]  (!%p900_p0), %s894_s6, 128, %s896_s8, %s177_s10  }
  0x2d   : > { %p1059_p1 = scmp.lt.s32.totalorder %s798_s17, 3  ;;  %p1060_p2 = scmp.ge.s32.totalorder %s798_s17, 1 }
  0x2f   : > { %p217_p5 = pnand %p1060_p2, %p1059_p1 }
  0x30   : > { %s936_s5 = sand.u32 (!%p217_p5), 1, %s782_s13  }
  0x31   : > { %220 = sbr.rel (%p217_p5) target bundleno = 227 (0xe3), region = 32  ;;  %s599_s7 = sshll.u32 (!%p217_p5), %s936_s5, 3 }
  0x32   : > { %s223_s11 = scalar_lea.sflag (!%p217_p5), [#allocation3], %s936_s5  ;;  %s226_s18 = scalar_lea.vmem (!%p217_p5), [#allocation2], %s599_s7 }
  0x38   : > { %769 = dma.done.wait (%p872_p8), %s223_s11, 128  }
  0x39   : > { %771 = vsyncadd (%p872_p8), %s223_s11, 4294967168  ;;  %v801_v0 = vmov 0   ;;  %v411_v1 = vld [vmem:[%s1051_s2] sm:$0xf]  ;;  %vm303_vm0 = vcmask 1043456   ;;  %v284_v10 = vlaneseq  ;;  %s600_s24 = sshll.u32 %s936_s5, 1 }
  0x3a   : > { %674 = vset.pattern.permute.xlu0 %v801_v0  ;;  %v289_v2 = vld [vmem:[%s226_s18] sm:$0xff]  ;;  %s954_s9 = scalar_lea.vmem [#allocation5], %s600_s24  ;;  %v802_v14 = vmov 0.0   ;;  %p268_p8 = scmp.lt.s32.totalorder %s790_s15, 1 }
  0x3b   : > { %414 = vperm.xlu0 %674, %v411_v1   ;;  %v301_v3 = vcombine.high %v289_v2, %v289_v2  ;;  %v304_v4 = vsel %vm303_vm0, %v289_v2, -inf  ;;  %vm950_vm1 = vcmp.lt.s32.totalorder %v284_v10, 256  ;;  %v963_v36 = vshrl.u32 %v284_v10, 7  ;;  %s608_s28 = sshll.u32 %s790_s15, 5  ;;  %s489_s29 = sshll.u32 %s954_s9, 4  ;;  %s999_s29 = int_to_ptr.vmem [resolvable:$true] %s489_s29 }
  0x3c   : > { %v305_v6 = vrot.slane %v304_v4, 4  ;;  %288 = vst.msk [vmem:[%s954_s9] sm:$0x3] %vm950_vm1, %v802_v14  ;;  %s269_s10 = scalar_select %p268_p8, %s790_s15, 1 }
  0x3d   : > { %v311_v5 = vsel %vm303_vm0, %v301_v3, -inf  ;;  %v350_v39 = vsub.s32 0, %v963_v36  ;;  %v354_v41 = vsub.s32 1, %v963_v36  ;;  %s997_s7 = scalar_lea.hbm %s1052_s3, %s608_s28  ;;  %s473_s11 = scalar_lea.sflag [#allocation4], %s936_s5 }
  0x3e   : > { %v312_v7 = vrot.slane %v311_v5, 4  ;;  %v306_v8 = vmax.f32 %v304_v4, %v305_v6  ;;  %s601_s19 = sshll.u32 %s269_s10, 1  ;;  %s716_s18 = scalar_lea.vmem %s999_s29, 32 }
  0x3f   : > { %s274_s23 = scalar_lea.vmem %s1050_s1, %s601_s19  ;;  %p717_p9 = scmp.ne.s32.totalorder %s999_s29, %s716_s18 }
  0x40   : > { %v313_v9 = vmax.f32 %v311_v5, %v312_v7  ;;  %v307_v11 = vrot.slane %v306_v8, 2  ;;  %v290_v42 = vld [vmem:[%s274_s23] sm:$0x3]  ;;  %p1063_p11 = scmp.ne.s32.totalorder %s1056_s25, 0  ;;  %s804_s15 = smov [#allocation5]  }
  0x41   : > { %v351_v44 = vrot.slane %v290_v42, %v350_v39  ;;  %v355_v45 = vrot.slane %v290_v42, %v354_v41  ;;  %s720_s6 = sshll.u32 %s804_s15, 4  ;;  %s721_s6 = int_to_ptr.vmem [resolvable:$false] %s720_s6 }
  0x42   : > { %v314_v12 = vrot.slane %v313_v9, 2  ;;  %v308_v15 = vmax.f32 %v306_v8, %v307_v11  ;;  %p718_p0 = pnand %p717_p9, %p1063_p11  ;;  %s722_s8 = scalar_lea.vmem %s721_s6, 64 }
  0x43   : > { %vm356_vm2 = vcmp.eq.s32.totalorder %v963_v36, %v351_v44  ;;  %vm357_vm3 = vcmp.eq.s32.totalorder %v963_v36, %v355_v45  ;;  %p723_p13 = scmp.lt.s32.totalorder %s999_s29, %s721_s6  ;;  %p724_p3 = scmp.lt.s32.totalorder %s722_s8, %s716_s18 }
  0x44   : > { %v315_v16 = vmax.f32 %v313_v9, %v314_v12  ;;  %v309_v17 = vrot.slane %v308_v15, 1  ;;  %p719_p7 = pneg %p718_p0 }
  0x45   : > { %p725_p6 = por %p724_p3, %p723_p13 }
  0x46   : > { %v316_v18 = vrot.slane %v315_v16, 1  ;;  %v310_v19 = vmax.f32 %v308_v15, %v309_v17 }
  0x47   : > { %p726_p4 = pnand %p725_p6, %p719_p7 }
  0x48   : > { %v317_v20 = vmax.f32 %v315_v16, %v316_v18 }
  0x4a   : > { %v320_v21 = vcombine.low %v310_v19, %v317_v20 }
  0x4c   : > { %v322_v22 = vsub.f32 %v289_v2, %v320_v21 }
  0x4e   : > { %v323_v23 = vmul.f32 1.442695, %v322_v22  ;;  %v359_v56 = vcombine.high %v322_v22, %v322_v22  ;;  %v361_v61 = vsel %vm356_vm2, %v322_v22, 0.0 }
  0x4f   : > { %v363_v3 = vsel %vm303_vm0, %v361_v61, 0.0 }
  0x50   : > { %676 = vpow2.f32 %v323_v23  ;;  %v362_v62 = vsel %vm357_vm3, %v359_v56, 0.0  ;;  %v364_v9 = vrot.slane %v363_v3, 4 }
  0x51   : > { %v370_v4 = vsel %vm303_vm0, %v362_v62, 0.0 }
  0x52   : > { %v371_v10 = vrot.slane %v370_v4, 4  ;;  %v365_v16 = vadd.f32 %v364_v9, %v363_v3 }
  0x54   : > { %v372_v17 = vadd.f32 %v371_v10, %v370_v4  ;;  %v366_v22 = vrot.slane %v365_v16, 2  ;;  %v447_v10 = vld [vmem:[%s954_s9] sm:$0x3] }
  0x56   : > { %v373_v23 = vrot.slane %v372_v17, 2 }
  0x5a   : > { %v677_v24 = vpop.eup %676 }
  0x5b   : > { %v326_v25 = vcombine.high %v677_v24, %v677_v24  ;;  %v328_v26 = vsel %vm303_vm0, %v677_v24, 0.0  ;;  %v377_v46 = vsel %vm356_vm2, %v677_v24, 0.0 }
  0x5c   : > { %v329_v28 = vrot.slane %v328_v26, 4  ;;  %v379_v49 = vsel %vm303_vm0, %v377_v46, 0.0 }
  0x5d   : > { %v335_v27 = vsel %vm303_vm0, %v326_v25, 0.0  ;;  %v378_v47 = vsel %vm357_vm3, %v326_v25, 0.0  ;;  %v380_v52 = vrot.slane %v379_v49, 4 }
  0x5e   : > { %v336_v29 = vrot.slane %v335_v27, 4  ;;  %v330_v30 = vadd.f32 %v329_v28, %v328_v26  ;;  %v386_v51 = vsel %vm303_vm0, %v378_v47, 0.0  ;;  %v367_v26 = vadd.f32 %v366_v22, %v365_v16 }
  0x5f   : > { %v387_v53 = vrot.slane %v386_v51, 4  ;;  %v381_v57 = vadd.f32 %v380_v52, %v379_v49  ;;  %v803_v52 = vmov 1966171168  }
  0x60   : > { %v337_v31 = vadd.f32 %v336_v29, %v335_v27  ;;  %v331_v32 = vrot.slane %v330_v30, 2  ;;  %v374_v27 = vadd.f32 %v373_v23, %v372_v17 }
  0x61   : > { %v388_v58 = vadd.f32 %v387_v53, %v386_v51  ;;  %v382_v63 = vrot.slane %v381_v57, 2  ;;  %v452_v53 = vunpack.c.l.s4 %v803_v52 }
  0x62   : > { %v338_v33 = vrot.slane %v337_v31, 2  ;;  %v332_v34 = vadd.f32 %v331_v32, %v330_v30 }
  0x63   : > { %v389_v0 = vrot.slane %v388_v58, 2  ;;  %v383_v5 = vadd.f32 %v382_v63, %v381_v57  ;;  %v453_v62 = vunpack.c.0.s8 %v452_v53 }
  0x64   : > { %v339_v35 = vadd.f32 %v338_v33, %v337_v31  ;;  %v333_v37 = vrot.slane %v332_v34, 1  ;;  %v368_v33 = vrot.slane %v367_v26, 1 }
  0x65   : > { %v390_v6 = vadd.f32 %v389_v0, %v388_v58  ;;  %v384_v11 = vrot.slane %v383_v5, 1 }
  0x66   : > { %v340_v38 = vrot.slane %v339_v35, 1  ;;  %v334_v40 = vadd.f32 %v333_v37, %v332_v34  ;;  %v375_v34 = vrot.slane %v374_v27, 1  ;;  %v369_v47 = vadd.f32 %v368_v33, %v367_v26 }
  0x67   : > { %v391_v12 = vrot.slane %v390_v6, 1  ;;  %v385_v18 = vadd.f32 %v384_v11, %v383_v5  ;;  %v456_v5 = vsub.s32 %v453_v62, %v963_v36 }
  0x68   : > { %v341_v43 = vadd.f32 %v340_v38, %v339_v35  ;;  %678 = vrcp.f32 %v334_v40 }
  0x69   : > { %v392_v19 = vadd.f32 %v391_v12, %v390_v6 }
  0x6a   : > { %680 = vrcp.f32 %v341_v43 }
  0x6b   : > { %682 = vlog2.f32 %v334_v40 }
  0x6c   : > { %684 = vlog2.f32 %v341_v43 }
  0x72   : > { %v679_v48 = vpop.eup %678 }
  0x73   : > { %v397_v54 = vmul.f32 %v679_v48, %v334_v40 }
  0x74   : > { %v681_v50 = vpop.eup %680 }
  0x75   : > { %v398_v55 = vmul.f32 %v681_v50, %v341_v43  ;;  %v399_v59 = vsub.f32 2.0, %v397_v54  ;;  %v683_v38 = vpop.eup %682 }
  0x76   : > { %v685_v41 = vpop.eup %684  ;;  %v343_v45 = vmul.f32 0.6931472, %v683_v38 }
  0x77   : > { %v400_v60 = vsub.f32 2.0, %v398_v55  ;;  %v401_v1 = vmul.f32 %v679_v48, %v399_v59  ;;  %v376_v48 = vadd.f32 %v375_v34, %v374_v27  ;;  %v345_v49 = vmul.f32 0.6931472, %v685_v41 }
  0x78   : > { %v393_v58 = vsub.f32 %v369_v47, %v343_v45 }
  0x79   : > { %v402_v2 = vmul.f32 %v681_v50, %v400_v60  ;;  %v403_v7 = vmul.f32 %v401_v1, %v334_v40  ;;  %v394_v59 = vsub.f32 %v376_v48, %v345_v49 }
  0x7b   : > { %v404_v8 = vmul.f32 %v402_v2, %v341_v43  ;;  %v405_v14 = vsub.f32 2.0, %v403_v7 }
  0x7d   : > { %v406_v15 = vsub.f32 2.0, %v404_v8  ;;  %v407_v20 = vmul.f32 %v405_v14, %v401_v1 }
  0x7f   : > { %v408_v21 = vmul.f32 %v406_v15, %v402_v2  ;;  %v409_v24 = vmul.f32 %v407_v20, %v385_v18 }
  0x81   : > { %v410_v25 = vmul.f32 %v408_v21, %v392_v19  ;;  %v435_v31 = vsub.f32 1.0, %v409_v24 }
  0x83   : > { %v436_v32 = vsub.f32 1.0, %v410_v25  ;;  %v437_v46 = vmax.f32 %v435_v31, 0.0 }
  0x85   : > { %v438_v44 = vmax.f32 %v436_v32, 0.0  ;;  %v439_v56 = vmul.f32 %v437_v46, %v437_v46 }
  0x87   : > { %v440_v57 = vmul.f32 %v438_v44, %v438_v44  ;;  %v441_v1 = vsub.f32 0.0, %v439_v56 }
  0x89   : > { %v442_v2 = vsub.f32 0.0, %v440_v57 }
  0xba   : > { %v415_v28 = vpop.permute.xlu0 %414 }
  0xbb   : > { %v417_v29 = vsel %vm356_vm2, %v415_v28, 0.0  ;;  %v418_v30 = vsel %vm357_vm3, %v415_v28, 0.0 }
  0xbc   : > { %v419_v35 = vsel %vm303_vm0, %v417_v29, 0.0  ;;  %v426_v37 = vsel %vm303_vm0, %v418_v30, 0.0 }
  0xbd   : > { %v420_v39 = vrot.slane %v419_v35, 4  ;;  %v427_v40 = vrot.slane %v426_v37, 4 }
  0xbf   : > { %v421_v42 = vadd.f32 %v420_v39, %v419_v35  ;;  %v428_v43 = vadd.f32 %v427_v40, %v426_v37 }
  0xc1   : > { %v422_v50 = vrot.slane %v421_v42, 2  ;;  %v429_v51 = vrot.slane %v428_v43, 2 }
  0xc3   : > { %v423_v54 = vadd.f32 %v422_v50, %v421_v42  ;;  %v430_v55 = vadd.f32 %v429_v51, %v428_v43 }
  0xc5   : > { %v424_v60 = vrot.slane %v423_v54, 1  ;;  %v431_v61 = vrot.slane %v430_v55, 1 }
  0xc7   : > { %v425_v63 = vadd.f32 %v424_v60, %v423_v54  ;;  %v432_v0 = vadd.f32 %v431_v61, %v430_v55 }
  0xc9   : > { %v433_v3 = vmul.f32 %v425_v63, %v393_v58  ;;  %v434_v4 = vmul.f32 %v432_v0, %v394_v59 }
  0xcb   : > { %v443_v6 = vmul.f32 %v441_v1, %v433_v3  ;;  %v444_v7 = vmul.f32 %v442_v2, %v434_v4 }
  0xcd   : > { %v450_v8 = vcombine.low %v443_v6, %v444_v7 }
  0xcf   : > { %v457_v9 = vrot.slane %v450_v8, %v456_v5 }
  0xd1   : > { %v464_v11 = vrot.slane %v457_v9, %v456_v5 }
  0xd3   : > { %v466_v12 = vadd.f32 %v464_v11, %v447_v10 }
  0xd5   : > { %471 = vst.msk [vmem:[%s954_s9] sm:$0x3] %vm950_vm1, %v466_v12 }
  0xd6   : > { %729 = shalt.err (!%p726_p4)
}
  0xd7   : > { %s730_s5 = scalar_lea.hbm %s997_s7, 32  ;;  %s734_s10 = scalar_lea.hbm %s1052_s3, 64 }
  0xd8   : > { %p731_p10 = scmp.ne.s32.totalorder %s997_s7, %s730_s5  ;;  %p735_p2 = scmp.lt.u32.totalorder %s997_s7, %s1052_s3 }
  0xd9   : > { %p736_p5 = scmp.lt.u32.totalorder %s734_s10, %s730_s5  ;;  %p738_p9 = scmp.lt.u32.totalorder %s730_s5, %s997_s7 }
  0xda   : > { %p732_p12 = pnand %p731_p10, %p1063_p11 }
  0xdb   : > { %p737_p8 = por %p736_p5, %p735_p2 }
  0xdc   : > { %p733_p1 = pneg %p732_p12 }
  0xdd   : > { %p739_p0 = por %p738_p9, %p737_p8 }
  0xdf   : > { %p740_p7 = pnand %p739_p0, %p733_p1 }
  0xe1   : > { %743 = shalt.err (!%p740_p7)
}
  0xe2   : > { %611 = dma.vmem_to_hbm [thread:$0]  (%p1063_p11), %s999_s29, 32, %s997_s7, %s473_s11  }
  0xe3 PF: > { %s501_s22 = sand.u32 1, %s778_s12   ;;  %p1064_p13 = scmp.ne.s32.totalorder %s1057_s27, 0 }
  0xe4   : > { %p1065_p3 = scmp.ge.s32.totalorder %s798_s17, 2  ;;  %s502_s23 = scalar_lea.sflag [#allocation4], %s501_s22 }
  0xe6   : > { %p618_p6 = pnand %p1065_p3, %p1064_p13 }
  0xe8   : > { %773 = dma.done.wait (!%p618_p6), %s502_s23, 32  }
  0xe9   : > { %775 = vsyncadd (!%p618_p6), %s502_s23, 4294967264  ;;  %s19_s17 = sadd.s32 1, %s798_s17   ;;  %s1066_s12 = smov %s782_s13 }
  0xea   : > { %p16_p4 = scmp.ge.s32.totalorder %s19_s17, 4   ;;  %s1067_s13 = smov %s786_s14 }
  0xeb   : > { %s1068_s14 = smov %s881_s26  ;;  %s1069_s15 = smov %s794_s16 }
  0xec   : > { %s1070_s16 = smov %s1072_s20  ;;  %18 = sbr.rel (!%p16_p4) target bundleno = 6 (0x6), region = 84 }
  0xf3   :  { %507 = vsyncpa [#allocation3], 1 }
  0xf4   :  { %509 = vsyncpa [#allocation3 + $0x1], 1 }
  0xf5   :  { %510 = vsyncpa [#allocation4], 1 }
  0xf6   :  { %512 = vsyncpa [#allocation4 + $0x1], 1 }

</bundles_post_ra>
